<compile_context>
chip_gen: v7x
topology: tpu7x:2x2x1
jax: 0.10.0
libtpu: 0.0.40
codegen_flags: <defaults>
</compile_context>

<pallas_src>
import functools
import math

import numpy as np
import jax
import jax.numpy as jnp
from jax.experimental import pallas as pl
from jax.experimental.pallas import tpu as pltpu


def sinusoidal_embeddings(max_seq_len: int, dim: int) -> jnp.ndarray:
    """Deterministic realization of the abstract PE.init_embeddings: (1, max_seq_len, dim)."""
    pos = np.arange(max_seq_len, dtype=np.float32)[:, None]
    div = np.exp(np.arange(0, dim, 2, dtype=np.float32) * (-math.log(10000.0) / dim))
    emb = np.zeros((max_seq_len, dim), dtype=np.float32)
    emb[:, 0::2] = np.sin(pos * div)
    emb[:, 1::2] = np.cos(pos * div)
    return jnp.asarray(emb)[None]  # (1, max_seq_len, dim)


def _pe_kernel(*refs, has_cls: bool, apply_dropout: bool, p: float):
    """One batch-tile per grid step.

    Ref order: x, emb, [cls], [bits], out
      x    : (TB, S, D)       VMEM
      emb  : (1, S_out, D)    VMEM, shared across batch (constant index_map)
      cls  : (1, 1, D)        VMEM, only when has_cls
      bits : (TB, S_out, D)   uint32 VMEM, only when apply_dropout
      out  : (TB, S_out, D)   VMEM
    """
    it = iter(refs)
    x_ref = next(it)
    emb_ref = next(it)
    cls_ref = next(it) if has_cls else None
    bits_ref = next(it) if apply_dropout else None
    o_ref = next(it)

    emb = emb_ref[...]  # (1, S_out, D)

    inv_keep = 1.0 / (1.0 - p) if p < 1.0 else 0.0
    thresh = jnp.asarray(min(int(p * 4294967296.0), 4294967295), dtype=jnp.uint32)

    def dropout(y, bits):
        if not apply_dropout:
            return y
        keep = bits >= thresh  # integer-threshold compare on raw uint32 bits
        return jnp.where(keep, y * jnp.asarray(inv_keep, y.dtype), jnp.zeros_like(y))

    if has_cls:
        TB, _, D = o_ref.shape
        # Row 0: CLS token + emb[0]; rows 1..S_out: x + emb[1:].  Two stores, no concat.
        head = jnp.broadcast_to(cls_ref[...] + emb[:, 0:1, :], (TB, 1, D))
        body = x_ref[...] + emb[:, 1:, :]
        if apply_dropout:
            head = dropout(head, bits_ref[:, 0:1, :])
            body = dropout(body, bits_ref[:, 1:, :])
        o_ref[:, 0:1, :] = head.astype(o_ref.dtype)
        o_ref[:, 1:, :] = body.astype(o_ref.dtype)
    else:
        y = x_ref[...] + emb
        if apply_dropout:
            y = dropout(y, bits_ref[...])
        o_ref[...] = y.astype(o_ref.dtype)


def pe_forward(x, embeddings, cls_token=None, *, p=0.1, training=False, rng_key=None,
               block_budget_bytes=4 << 20):
    """Pallas implementation of PE.forward.

    x          : (B, S, D)
    embeddings : (1, max_seq_len, D)
    cls_token  : None or (1, 1, D)
    returns    : (B, S + has_cls, D)
    """
    B, S, D = x.shape
    has_cls = cls_token is not None
    S_out = S + (1 if has_cls else 0)
    apply_dropout = bool(training) and float(p) > 0.0

    # Slice + cast the table in the wrapper so the kernel block equals the full (S_out, D)
    # extent (keeps the (8,128)/full-dim block rule satisfied for any S_out) and so the
    # in-kernel add is same-dtype (no per-element widening).
    emb = embeddings[:, :S_out, :].astype(x.dtype)

    # Pack as many batch rows per block as fit a conservative per-array budget
    # (sized with v7x's 64 MiB physical VMEM and double-buffering in mind).
    itemsize = jnp.dtype(x.dtype).itemsize
    slab_bytes = max(S_out * D * itemsize, 1)
    TB = max(1, min(B, block_budget_bytes // slab_bytes))
    while B % TB:  # keep blocks evenly dividing the batch (no ragged edge blocks)
        TB -= 1
    grid = (B // TB,)
    # TODO(synk): for very large S*D (a single-batch slab exceeding the budget) add a
    # sequence-tile grid axis sized per-generation instead of whole-sequence slabs.

    in_specs = [
        pl.BlockSpec((TB, S, D), lambda b: (b, 0, 0)),       # x (per batch-tile)
        pl.BlockSpec((1, S_out, D), lambda b: (0, 0, 0)),    # embeddings (resident)
    ]
    operands = [x, emb]
    if has_cls:
        in_specs.append(pl.BlockSpec((1, 1, D), lambda b: (0, 0, 0)))
        operands.append(cls_token.astype(x.dtype))
    if apply_dropout:
        if rng_key is None:
            rng_key = jax.random.PRNGKey(0)
        bits = jax.random.bits(rng_key, (B, S_out, D), dtype=jnp.uint32)
        in_specs.append(pl.BlockSpec((TB, S_out, D), lambda b: (b, 0, 0)))
        operands.append(bits)

    kernel = functools.partial(_pe_kernel, has_cls=has_cls,
                               apply_dropout=apply_dropout, p=float(p))

    return pl.pallas_call(
        kernel,
        out_shape=jax.ShapeDtypeStruct((B, S_out, D), x.dtype),
        grid=grid,
        in_specs=in_specs,
        out_specs=pl.BlockSpec((TB, S_out, D), lambda b: (b, 0, 0)),
        compiler_params=pltpu.CompilerParams(dimension_semantics=("parallel",)),
    )(*operands)


if __name__ == "__main__":
    # Module config: max_seq_len=16, dim=128 (lane-dense last dim), add_cls_token=True,
    # dropout=0.1.  Input: batch=2, seq=8.
    B, S, D = 2, 8, 128
    MAX_SEQ_LEN = 16
    P_DROP = 0.1

    key = jax.random.PRNGKey(0)
    kx, kcls, kdrop = jax.random.split(key, 3)
    x = jax.random.normal(kx, (B, S, D), dtype=jnp.float32)
    cls_token = jax.random.normal(kcls, (1, 1, D), dtype=jnp.float32)  # nn.Parameter(randn(1,1,dim))
    embeddings = sinusoidal_embeddings(MAX_SEQ_LEN, D)                 # init_embeddings()

    # Pure-JAX reference of PE.forward (pre-dropout).
    ref_cls = (jnp.concatenate([jnp.broadcast_to(cls_token, (B, 1, D)), x], axis=1)
               + embeddings[:, :S + 1, :])

    # --- eval mode (dropout == identity) ---
    out_eval = pe_forward(x, embeddings, cls_token, p=P_DROP, training=False)
    jax.block_until_ready(out_eval)
    assert out_eval.shape == (B, S + 1, D)
    np.testing.assert_allclose(np.asarray(out_eval), np.asarray(ref_cls), rtol=1e-6, atol=1e-6)

    # --- train mode: every element is either 0 (dropped) or ref/(1-p) (kept) ---
    out_train = pe_forward(x, embeddings, cls_token, p=P_DROP, training=True, rng_key=kdrop)
    jax.block_until_ready(out_train)
    o = np.asarray(out_train)
    r = np.asarray(ref_cls) / (1.0 - P_DROP)
    dropped = o == 0.0
    np.testing.assert_allclose(o[~dropped], r[~dropped], rtol=1e-5, atol=1e-5)
    n_drop = int(dropped.sum())
    assert 0 < n_drop < o.size, f"implausible drop count {n_drop}/{o.size}"

    # --- no-cls-token path ---
    out_nocls = pe_forward(x, embeddings, None, p=P_DROP, training=False)
    jax.block_until_ready(out_nocls)
    np.testing.assert_allclose(np.asarray(out_nocls),
                               np.asarray(x + embeddings[:, :S, :]),
                               rtol=1e-6, atol=1e-6)

    print("KERNEL_OK")
</pallas_src>

<mosaic_0001>
module attributes {stable_mosaic.version = 11 : i64} {
  func.func @_pe_kernel(%arg0: i32, %arg1: memref<2x8x128xf32, #tpu.memory_space<vmem>>, %arg2: memref<1x9x128xf32, #tpu.memory_space<vmem>>, %arg3: memref<1x1x128xf32, #tpu.memory_space<vmem>>, %arg4: memref<2x9x128xf32, #tpu.memory_space<vmem>>) attributes {dimension_semantics = [#tpu.dimension_semantics<parallel>], iteration_bounds = array<i64: 1>, scalar_prefetch = 0 : i64, scratch_operands = 0 : i64, tpu.core_type = #tpu.core_type<tc>, window_params = [{transform_indices = @transform_0, window_bounds = array<i64: 2, 8, 128>}, {pipeline_mode = #tpu.pipeline_mode<synchronous>, transform_indices = @transform_1, window_bounds = array<i64: 1, 9, 128>}, {pipeline_mode = #tpu.pipeline_mode<synchronous>, transform_indices = @transform_2, window_bounds = array<i64: 1, 1, 128>}, {transform_indices = @transform_3, window_bounds = array<i64: 2, 9, 128>}]} {
    %c0 = arith.constant 0 : index
    %c0_0 = arith.constant 0 : index
    %c0_1 = arith.constant 0 : index
    %0 = vector.load %arg2[%c0, %c0_0, %c0_1] : memref<1x9x128xf32, #tpu.memory_space<vmem>>, vector<1x9x128xf32>
    %c0_2 = arith.constant 0 : index
    %c0_3 = arith.constant 0 : index
    %c0_4 = arith.constant 0 : index
    %1 = vector.load %arg3[%c0_2, %c0_3, %c0_4] : memref<1x1x128xf32, #tpu.memory_space<vmem>>, vector<1x1x128xf32>
    %2 = vector.extract_strided_slice %0 {offsets = [0, 0, 0], sizes = [1, 1, 128], strides = [1, 1, 1]} : vector<1x9x128xf32> to vector<1x1x128xf32>
    %3 = arith.addf %1, %2 : vector<1x1x128xf32>
    %4 = vector.shape_cast %3 : vector<1x1x128xf32> to vector<1x1x128xf32>
    %5 = vector.broadcast %4 : vector<1x1x128xf32> to vector<2x1x128xf32>
    %c0_5 = arith.constant 0 : index
    %c0_6 = arith.constant 0 : index
    %c0_7 = arith.constant 0 : index
    %6 = vector.load %arg1[%c0_5, %c0_6, %c0_7] : memref<2x8x128xf32, #tpu.memory_space<vmem>>, vector<2x8x128xf32>
    %7 = vector.extract_strided_slice %0 {offsets = [0, 1, 0], sizes = [1, 8, 128], strides = [1, 1, 1]} : vector<1x9x128xf32> to vector<1x8x128xf32>
    %8 = vector.broadcast %7 : vector<1x8x128xf32> to vector<2x8x128xf32>
    %9 = arith.addf %6, %8 : vector<2x8x128xf32>
    %c0_8 = arith.constant 0 : index
    %c0_9 = arith.constant 0 : index
    %c0_10 = arith.constant 0 : index
    %10 = vector.load %arg4[%c0_8, %c0_9, %c0_10] : memref<2x9x128xf32, #tpu.memory_space<vmem>>, vector<2x1x128xf32>
    tpu.vector_store %arg4[%c0_8, %c0_9, %c0_10], %5 {strides = array<i32>} : memref<2x9x128xf32, #tpu.memory_space<vmem>>, vector<2x1x128xf32>,
    %c0_11 = arith.constant 0 : index
    %c1 = arith.constant 1 : index
    %c0_12 = arith.constant 0 : index
    %11 = vector.load %arg4[%c0_11, %c1, %c0_12] : memref<2x9x128xf32, #tpu.memory_space<vmem>>, vector<2x8x128xf32>
    tpu.vector_store %arg4[%c0_11, %c1, %c0_12], %9 {strides = array<i32>} : memref<2x9x128xf32, #tpu.memory_space<vmem>>, vector<2x8x128xf32>,
    return
  }
  func.func @transform_0(%arg0: i32) -> (i32, i32, i32) {
    %c0_i32 = arith.constant 0 : i32
    %c0_i32_0 = arith.constant 0 : i32
    %c0_i32_1 = arith.constant 0 : i32
    return %arg0, %c0_i32, %c0_i32_0 : i32, i32, i32
  }
  func.func @transform_1(%arg0: i32) -> (i32, i32, i32) {
    %c0_i32 = arith.constant 0 : i32
    %c0_i32_0 = arith.constant 0 : i32
    %c0_i32_1 = arith.constant 0 : i32
    %c0_i32_2 = arith.constant 0 : i32
    return %c0_i32, %c0_i32_0, %c0_i32_1 : i32, i32, i32
  }
  func.func @transform_2(%arg0: i32) -> (i32, i32, i32) {
    %c0_i32 = arith.constant 0 : i32
    %c0_i32_0 = arith.constant 0 : i32
    %c0_i32_1 = arith.constant 0 : i32
    %c0_i32_2 = arith.constant 0 : i32
    return %c0_i32, %c0_i32_0, %c0_i32_1 : i32, i32, i32
  }
  func.func @transform_3(%arg0: i32) -> (i32, i32, i32) {
    %c0_i32 = arith.constant 0 : i32
    %c0_i32_0 = arith.constant 0 : i32
    %c0_i32_1 = arith.constant 0 : i32
    return %arg0, %c0_i32, %c0_i32_0 : i32, i32, i32
  }
}

</mosaic_0001>

<bundles_post_ra>
// kernel: tpu_custom_call.1
= control target key start
LH: loop header
LB: loop body
LE: loop exit
PB: predicated region body
PF: predicated region fallthrough
CT: control target
= control target key end

     0   :  { %vm22_vm0 = vcmask 1046528   ;;  %s84_s1 = inlined_call_operand.vmem [shape: f32[1,9,128], index: 1, kind: input, shape index: {}]   ;;  %s85_s2 = inlined_call_operand.vmem [shape: f32[1,1,128], index: 2, kind: input, shape index: {}]   ;;  %s86_s0 = inlined_call_operand.vmem [shape: f32[2,8,128], index: 0, kind: input, shape index: {}]   ;;  %s87_s3 = inlined_call_operand.vmem [shape: f32[2,9,128], index: 3, kind: output, shape index: {}]  }
   0x1   :  { %v14_v0 = vld [vmem:[%s84_s1] sm:$0xff]  ;;  %v15_v1 = vld [vmem:[%s84_s1 + $0x8] sm:$0x1] }
   0x2   :  { %v16_v2 = vld [vmem:[%s85_s2] sm:$0x1]  ;;  %v23_v4 = vrot.slane %v14_v0, 1  ;;  %v24_v5 = vrot.slane %v15_v1, 1  ;;  %v19_v7 = vld [vmem:[%s86_s0 + $0x8] sm:$0xff] }
   0x3   :  { %v17_v3 = vadd.f32 %v16_v2, %v14_v0  ;;  %v18_v6 = vld [vmem:[%s86_s0] sm:$0xff] }
   0x4   :  { %v25_v8 = vsel %vm22_vm0, %v23_v4, %v24_v5 }
   0x5   :  { %29 = vst [vmem:[%s87_s3] sm:$0x1] %v17_v3  ;;  %30 = vst [vmem:[%s87_s3 + $0x10] sm:$0x1] %v17_v3  ;;  %v27_v9 = vadd.f32 %v25_v8, %v18_v6  ;;  %v28_v10 = vadd.f32 %v25_v8, %v19_v7 }
   0x7   :  { %31 = vst [vmem:[%s87_s3 + $0x1] sm:$0xff] %v27_v9  ;;  %32 = vst [vmem:[%s87_s3 + $0x11] sm:$0xff] %v28_v10 }

</bundles_post_ra>
